<compile_context>
chip_gen: v7x
topology: tpu7x:2x2x1
jax: 0.10.0
libtpu: 0.0.40
codegen_flags: <defaults>
</compile_context>

<pallas_src>
import functools

import jax
import jax.numpy as jnp
import numpy as np
from jax.experimental import pallas as pl
from jax.experimental.pallas import tpu as pltpu


# ----------------------------------------------------------------------------
# Pallas kernel: one row-tile of the im2col matmul, fused bias + ReLU + store.
# ----------------------------------------------------------------------------
def _conv_mm_kernel(slab_ref, w_ref, *rest, relu, has_bias, transpose_out):
    if has_bias:
        b_ref, out_ref = rest
    else:
        (out_ref,) = rest

    acc = jnp.dot(slab_ref[...], w_ref[...],
                  preferred_element_type=jnp.float32)      # (tile_m, Cout) f32
    if has_bias:
        acc = acc + b_ref[...]                             # (1, Cout) broadcast
    if relu:
        acc = jnp.maximum(acc, 0.0)

    if transpose_out:
        out_ref[...] = acc.T                               # (Cout, tile_m) lane-dense
    else:
        out_ref[...] = acc                                 # (tile_m, Cout) lane-dense


# ----------------------------------------------------------------------------
# Tile sizing for the fused batch*spatial axis.
# ----------------------------------------------------------------------------
def _pick_tile_m(M, lane_tiled, target=2048):
    """Largest divisor of M <= target with the right granularity; prefer >=2
    grid steps (v7x megacore) when it doesn't shrink tiles below one vreg."""
    g = 128 if lane_tiled else 8
    if M % g != 0:
        return M                      # single full-extent block (always legal)
    t = min(M, target) - (min(M, target) % g)
    best = M
    while t >= g:
        if M % t == 0:
            best = t
            break
        t -= g
    if best == M and M >= 2 * g and (M // 2) % g == 0:
        best = M // 2                 # split into 2 parallel steps for v7x
    return best


# ----------------------------------------------------------------------------
# Wrapper: BasicConv forward (conv -> [bn] -> [relu]); NCHW in / NCHW out.
# ----------------------------------------------------------------------------
def basic_conv_pallas(x_nchw, weight_oihw, bias=None, *, stride=1, padding=0,
                      dilation=1, groups=1, relu=True):
    # TODO(synk): stride/dilation/groups != 1 and bn=True (BatchNorm2d) are not
    # implemented; the module's default config (1/1/1, bn=False) is covered.
    assert stride == 1 and dilation == 1 and groups == 1

    B, Cin, H, W = x_nchw.shape
    Cout, Cin_w, K, K2 = weight_oihw.shape
    assert Cin_w == Cin and K == K2
    P = int(padding)
    Ho = H + 2 * P - K + 1
    Wo = W + 2 * P - K + 1
    KKC = K * K * Cin
    M = B * Ho * Wo

    # ---- wrapper-side layout plumbing (XLA): pad + im2col + dtype cast ------
    x_nhwc = jnp.transpose(x_nchw, (0, 2, 3, 1)).astype(jnp.bfloat16)
    if P > 0:
        x_nhwc = jnp.pad(x_nhwc, ((0, 0), (P, P), (P, P), (0, 0)))
    taps = [x_nhwc[:, kh:kh + Ho, kw:kw + Wo, :]
            for kh in range(K) for kw in range(K)]
    slab = jnp.concatenate(taps, axis=-1).reshape(M, KKC)   # (M, K*K*Cin) bf16

    # weights OIHW -> (kh, kw, ci) x co, flattened; matches the tap ordering.
    w2d = jnp.transpose(weight_oihw, (2, 3, 1, 0)).reshape(KKC, Cout)
    w2d = w2d.astype(jnp.bfloat16)

    has_bias = bias is not None
    transpose_out = Cout < 128        # put the long axis on lanes when Cout small
    tile_m = _pick_tile_m(M, lane_tiled=transpose_out)
    grid = (M // tile_m,)

    kernel = functools.partial(_conv_mm_kernel, relu=relu, has_bias=has_bias,
                               transpose_out=transpose_out)

    in_specs = [
        pl.BlockSpec((tile_m, KKC), lambda i: (i, 0)),
        pl.BlockSpec((KKC, Cout), lambda i: (0, 0)),
    ]
    args = [slab, w2d]
    if has_bias:
        in_specs.append(pl.BlockSpec((1, Cout), lambda i: (0, 0)))
        args.append(jnp.reshape(bias, (1, Cout)).astype(jnp.float32))

    if transpose_out:
        out_shape = jax.ShapeDtypeStruct((Cout, M), jnp.float32)
        out_spec = pl.BlockSpec((Cout, tile_m), lambda i: (0, i))
    else:
        out_shape = jax.ShapeDtypeStruct((M, Cout), jnp.float32)
        out_spec = pl.BlockSpec((tile_m, Cout), lambda i: (i, 0))

    bias_bytes = Cout * 4 if has_bias else 0
    cost = pl.CostEstimate(
        flops=2 * M * KKC * Cout,
        transcendentals=0,
        bytes_accessed=M * KKC * 2 + KKC * Cout * 2 + M * Cout * 4 + bias_bytes,
    )

    out_flat = pl.pallas_call(
        kernel,
        out_shape=out_shape,
        grid=grid,
        in_specs=in_specs,
        out_specs=out_spec,
        compiler_params=pltpu.CompilerParams(
            dimension_semantics=("parallel",)),
        cost_estimate=cost,
    )(*args)

    if transpose_out:
        return out_flat.reshape(Cout, B, Ho, Wo).transpose(1, 0, 2, 3)
    return out_flat.reshape(B, Ho, Wo, Cout).transpose(0, 3, 1, 2)


# ----------------------------------------------------------------------------
# Pure-JAX reference (matches the PyTorch module, NCHW, f32/HIGHEST)
# ----------------------------------------------------------------------------
def basic_conv_reference(x_nchw, weight, bias=None, *, padding=0, relu=True):
    out = jax.lax.conv_general_dilated(
        x_nchw, weight, (1, 1), [(padding, padding), (padding, padding)],
        dimension_numbers=("NCHW", "OIHW", "NCHW"),
        precision=jax.lax.Precision.HIGHEST)
    if bias is not None:
        out = out + bias[None, :, None, None]
    if relu:
        out = jnp.maximum(out, 0.0)
    return out


# ----------------------------------------------------------------------------
if __name__ == "__main__":
    B, Cin, H, W = 2, 4, 16, 16
    Cout, K, P = 8, 3, 1      # BasicConv(4, 8, 3, padding=1) — relu, no bn, no bias

    key = jax.random.PRNGKey(0)
    kx, kw = jax.random.split(key)
    x = jax.random.normal(kx, (B, Cin, H, W), jnp.float32)
    w = jax.random.normal(kw, (Cout, Cin, K, K), jnp.float32) * 0.1

    out = basic_conv_pallas(x, w, padding=P, relu=True)
    jax.block_until_ready(out)

    ref = basic_conv_reference(x, w, padding=P, relu=True)
    # Tolerance documents the bf16-input / f32-accumulate MXU path vs the
    # f32 HIGHEST-precision reference (inference-grade precision).
    assert np.allclose(np.asarray(out), np.asarray(ref), atol=3e-2, rtol=3e-2), (
        "Pallas BasicConv output mismatch vs reference")

    print("KERNEL_OK")
</pallas_src>

<mosaic_0001>
module attributes {stable_mosaic.version = 11 : i64} {
  func.func @_conv_mm_kernel(%arg0: i32, %arg1: memref<256x36xbf16, #tpu.memory_space<vmem>>, %arg2: memref<36x8xbf16, #tpu.memory_space<vmem>>, %arg3: memref<8x256xf32, #tpu.memory_space<vmem>>) attributes {dimension_semantics = [#tpu.dimension_semantics<parallel>], iteration_bounds = array<i64: 2>, scalar_prefetch = 0 : i64, scratch_operands = 0 : i64, tpu.core_type = #tpu.core_type<tc>, window_params = [{transform_indices = @transform_0, window_bounds = array<i64: 256, 36>}, {pipeline_mode = #tpu.pipeline_mode<synchronous>, transform_indices = @transform_1, window_bounds = array<i64: 36, 8>}, {transform_indices = @transform_2, window_bounds = array<i64: 8, 256>}]} {
    %c0 = arith.constant 0 : index
    %c0_0 = arith.constant 0 : index
    %0 = vector.load %arg1[%c0, %c0_0] : memref<256x36xbf16, #tpu.memory_space<vmem>>, vector<256x36xbf16>
    %c0_1 = arith.constant 0 : index
    %c0_2 = arith.constant 0 : index
    %1 = vector.load %arg2[%c0_1, %c0_2] : memref<36x8xbf16, #tpu.memory_space<vmem>>, vector<36x8xbf16>
    %cst = arith.constant dense<0.000000e+00> : vector<256x8xf32>
    %2 = tpu.matmul %0, %1, %cst {dimension_numbers = #tpu.dot_dimension_numbers<[1], [0], [0], [1], [0, 0, 1, 1], [], []>} : vector<256x36xbf16>, vector<36x8xbf16>, vector<256x8xf32> -> vector<256x8xf32>
    %cst_3 = arith.constant 0.000000e+00 : f32
    %3 = vector.broadcast %cst_3 : f32 to vector<256x8xf32>
    %4 = arith.maximumf %2, %3 : vector<256x8xf32>
    %5 = tpu.transpose %4, [1, 0] : vector<256x8xf32> -> vector<8x256xf32>
    %c0_4 = arith.constant 0 : index
    %c0_5 = arith.constant 0 : index
    %6 = vector.load %arg3[%c0_4, %c0_5] : memref<8x256xf32, #tpu.memory_space<vmem>>, vector<8x256xf32>
    tpu.vector_store %arg3[%c0_4, %c0_5], %5 {strides = array<i32>} : memref<8x256xf32, #tpu.memory_space<vmem>>, vector<8x256xf32>,
    return
  }
  func.func @transform_0(%arg0: i32) -> (i32, i32) {
    %c0_i32 = arith.constant 0 : i32
    %c0_i32_0 = arith.constant 0 : i32
    return %arg0, %c0_i32 : i32, i32
  }
  func.func @transform_1(%arg0: i32) -> (i32, i32) {
    %c0_i32 = arith.constant 0 : i32
    %c0_i32_0 = arith.constant 0 : i32
    %c0_i32_1 = arith.constant 0 : i32
    return %c0_i32, %c0_i32_0 : i32, i32
  }
  func.func @transform_2(%arg0: i32) -> (i32, i32) {
    %c0_i32 = arith.constant 0 : i32
    %c0_i32_0 = arith.constant 0 : i32
    return %c0_i32, %arg0 : i32, i32
  }
}

</mosaic_0001>

<bundles_post_ra>
// kernel: tpu_custom_call.1
= control target key start
LH: loop header
LB: loop body
LE: loop exit
PB: predicated region body
PF: predicated region fallthrough
CT: control target
= control target key end

     0   :  { %7 = vsyncpa [#allocation3], 0  ;;  %s1057_s0 = inlined_call_operand.vmem [shape: bf16[512,36], index: 0, kind: input, shape index: {}]   ;;  %s1058_s1 = inlined_call_operand.vmem [shape: bf16[36,8], index: 1, kind: input, shape index: {}]   ;;  %s1059_s2 = inlined_call_operand.hbm [shape: f32[8,512], index: 2, kind: output, shape index: {}]  }
   0x1   :  { %9 = vsyncpa [#allocation3 + $0x1], 0  ;;  %s915_s9 = smov 0   ;;  %s917_s10 = smov 0  }
   0x2   :  { %s919_s11 = smov 0   ;;  %s921_s12 = smov 0  }
   0x3 LB: > { %s936_s13 = sadd.s32 4294967295, %s897_s12   ;;  %s664_s14 = sadd.s32 4294967294, %s897_s12   ;;  %s897_s12 = sphi %s921_s12, %s1065_s12   ;;  %s893_s11 = sphi %s919_s11, %s1064_s11   ;;  %s889_s10 = sphi %s917_s10, %s1063_s10   ;;  %s885_s9 = sphi %s915_s9, %s1062_s9  }
   0x4   : > { %s940_s15 = sadd.s32 1, %s897_s12   ;;  %s69_s16 = sadd.s32 1, %s893_s11 }
   0x5   : > { %s66_s17 = ssub.s32 %s897_s12, %s940_s15  ;;  %p79_p0 = scmp.ne.s32.totalorder %s893_s11, %s889_s10 }
   0x6   : > { %p67_p1 = scmp.eq.s32.totalorder %s66_s17, 0  ;;  %p80_p2 = scmp.eq.s32.totalorder %s936_s13, 1 }
   0x7   : > { %p85_p3 = scmp.ne.s32.totalorder %s889_s10, %s885_s9  ;;  %p86_p4 = scmp.eq.s32.totalorder %s664_s14, 1 }
   0x8   : > { %s951_s18 = scalar_select %p67_p1, %s893_s11, %s69_s16  }
   0x9   : > { %p953_p5 = por %p80_p2, %p79_p0  ;;  %p957_p6 = por %p86_p4, %p85_p3 }
   0xa   : > { %p667_p7 = scmp.ge.s32.totalorder %s897_s12, 1  ;;  %p116_p8 = scmp.lt.s32.totalorder %s897_s12, 3 }
   0xc   : > { %p117_p9 = pnand %p667_p7, %p116_p8 }
   0xd   : > { %v816_v0 = vld [vmem:[%s1058_s1] sm:$0xff] (!%p117_p9)   ;;  %v817_v1 = vld [vmem:[%s1058_s1 + $0x8] sm:$0xff] (!%p117_p9)   ;;  %s669_s25 = sshll.u32 (!%p117_p9), %s936_s13, 5  ;;  %v818_v2 = vld [vmem:[%s1058_s1 + $0x10] ss:$0 sps:$4 sm:$0x33] (!%p117_p9)  }
   0xe   : > { %120 = sbr.rel (%p117_p9) target bundleno = 385 (0x181), region = 28  ;;  %731 = vmatprep.subr.bf16.mxu0 (!%p117_p9), %v816_v0  ;;  %769 = vmatprep.subr.bf16.mxu1 (!%p117_p9), %v816_v0  ;;  %p139_p10 = scmp.lt.s32.totalorder (!%p117_p9), %s669_s25, 63  ;;  %vm327_vm0 = vcmask (!%p117_p9), 1041408   ;;  %vm278_vm1 = vcmask (!%p117_p9), 293888  }
   0xf   : > { %732 = vmatpush3.bf16.msra.mxu0 (!%p117_p9), %v816_v0  ;;  %772 = vmatpush3.bf16.msra.mxu1 (!%p117_p9), %v816_v0  ;;  %v329_v3 = vsel (!%p117_p9), %vm327_vm0, %v818_v2, 0  ;;  %s135_s4 = sand.u32 (!%p117_p9), 1, %s889_s10   ;;  %s711_s8 = sshll.u32 (!%p117_p9), %s936_s13, 8 }
  0x10   : > { %733 = vmatprep.subr.bf16.mxu0 (!%p117_p9), %v817_v1  ;;  %770 = vmatprep.subr.bf16.mxu1 (!%p117_p9), %v817_v1  ;;  %s668_s5 = sshll.u32 (!%p117_p9), %s135_s4, 4  ;;  %s1017_s17 = scalar_lea.hbm (!%p117_p9), %s1059_s2, %s711_s8 }
  0x11   : > { %s137_s6 = scalar_lea.vmem (!%p117_p9), [#allocation2], %s668_s5  ;;  %s591_s21 = scalar_lea.sflag (!%p117_p9), [#allocation3], %s135_s4 }
  0x12   : > { %s605_s7 = sshll.u32 (!%p117_p9), %s137_s6, 4  ;;  %s899_s13 = smov (!%p117_p9), [#allocation2]   ;;  %s1012_s7 = int_to_ptr.vmem [resolvable:$true] %s605_s7 }
  0x13   : > { %734 = vmatpush3.bf16.msra.mxu0 (!%p117_p9), %v817_v1  ;;  %773 = vmatpush3.bf16.msra.mxu1 (!%p117_p9), %v817_v1  ;;  %s835_s22 = scalar_lea.vmem (!%p117_p9), %s1012_s7, 256  ;;  %s839_s23 = sshll.u32 (!%p117_p9), %s899_s13, 4  ;;  %s840_s23 = int_to_ptr.vmem [resolvable:$false] %s839_s23 }
  0x14   : > { %775 = vmatprep.subr.msk.bf16.mxu0 (!%p117_p9), %vm327_vm0, %v818_v2  ;;  %776 = vmatprep.subr.msk.bf16.mxu1 (!%p117_p9), %vm327_vm0, %v818_v2  ;;  %p836_p11 = scmp.ne.s32.totalorder (!%p117_p9), %s1012_s7, %s835_s22  ;;  %s841_s24 = scalar_lea.vmem (!%p117_p9), %s840_s23, 512 }
  0x15   : > { %s1067_s25 = smov (!%p139_p10, %s669_s25), 63  ;;  %p842_p0 = scmp.lt.s32.totalorder %s1012_s7, %s840_s23 }
  0x16   : > { %s670_s28 = sshll.u32 %s1067_s25, 2  ;;  %p837_p12 = pnand %p836_p11, %p953_p5 }
  0x17   : > { %s976_s3 = scalar_lea.vmem %s1057_s0, %s670_s28  ;;  %736 = vmatpush3.bf16.msra.mxu0 %v329_v3  ;;  %774 = vmatpush3.bf16.msra.mxu1 %v329_v3  ;;  %p843_p1 = scmp.lt.s32.totalorder %s841_s24, %s835_s22 }
  0x18   : > { %v819_v4 = vld [vmem:[%s976_s3] sm:$0xff]   ;;  %v821_v6 = vld [vmem:[%s976_s3 + $0x8] sm:$0xff]   ;;  %v823_v8 = vld [vmem:[%s976_s3 + $0x10] sm:$0xff]   ;;  %p838_p13 = pneg %p837_p12 }
  0x19   : > { %v820_v5 = vld [vmem:[%s976_s3 + $0x40] sm:$0xff]   ;;  %737 = vmatprep.mubr.msk.bf16.mxu0 %vm278_vm1, %v819_v4  ;;  %v822_v7 = vld [vmem:[%s976_s3 + $0x48] sm:$0xff]   ;;  %v824_v9 = vld [vmem:[%s976_s3 + $0x50] sm:$0xff]   ;;  %p844_p2 = por %p843_p1, %p842_p0 }
  0x1a   : > { %753 = vmatprep.mubr.msk.bf16.mxu1 %vm278_vm1, %v820_v5  ;;  %738 = vmatmul.mubr.msk.bf16.vlgmr.msra.gmra.mrb[0].mxu0 %vm278_vm1, %v821_v6  ;;  %v825_v10 = vld [vmem:[%s976_s3 + $0x18] sm:$0xff]   ;;  %v827_v12 = vld [vmem:[%s976_s3 + $0x20] sm:$0xff]   ;;  %v829_v14 = vld [vmem:[%s976_s3 + $0x28] sm:$0xff]  }
  0x1b   : > { %754 = vmatmul.mubr.msk.bf16.vlgmr.msra.gmra.mrb[0].mxu1 %vm278_vm1, %v822_v7  ;;  %741 = vmatprep.mubr.msk.bf16.mxu0 %vm278_vm1, %v823_v8  ;;  %v826_v11 = vld [vmem:[%s976_s3 + $0x58] sm:$0xff]   ;;  %v828_v13 = vld [vmem:[%s976_s3 + $0x60] sm:$0xff]   ;;  %v830_v15 = vld [vmem:[%s976_s3 + $0x68] sm:$0xff]   ;;  %p845_p3 = pnand %p844_p2, %p838_p13 }
  0x1c   : > { %757 = vmatprep.mubr.msk.bf16.mxu1 %vm278_vm1, %v824_v9  ;;  %v831_v16 = vld [vmem:[%s976_s3 + $0x30] sm:$0xff]   ;;  %v833_v18 = vld [vmem:[%s976_s3 + $0x38] sm:$0xff]  }
  0x1d   : > { %v832_v17 = vld [vmem:[%s976_s3 + $0x70] sm:$0xff]   ;;  %v834_v19 = vld [vmem:[%s976_s3 + $0x78] sm:$0xff]  }
  0x22   : > { %742 = vmatmul.mubr.msk.bf16.gmra.mrb[4].mxu0 %vm278_vm1, %v825_v10 }
  0x23   : > { %758 = vmatmul.mubr.msk.bf16.gmra.mrb[4].mxu1 %vm278_vm1, %v826_v11  ;;  %745 = vmatprep.mubr.msk.bf16.mxu0 %vm278_vm1, %v827_v12 }
  0x24   : > { %761 = vmatprep.mubr.msk.bf16.mxu1 %vm278_vm1, %v828_v13 }
  0x2a   : > { %746 = vmatmul.mubr.msk.bf16.gmra.mrb[8].mxu0 %vm278_vm1, %v829_v14 }
  0x2b   : > { %762 = vmatmul.mubr.msk.bf16.gmra.mrb[8].mxu1 %vm278_vm1, %v830_v15  ;;  %749 = vmatprep.mubr.msk.bf16.mxu0 %vm278_vm1, %v831_v16 }
  0x2c   : > { %765 = vmatprep.mubr.msk.bf16.mxu1 %vm278_vm1, %v832_v17 }
  0x32   : > { %750 = vmatmul.mubr.msk.bf16.gmra.mrb[12].mxu0 %vm278_vm1, %v833_v18 }
  0x33   : > { %766 = vmatmul.mubr.msk.bf16.gmra.mrb[12].mxu1 %vm278_vm1, %v834_v19 }
  0xed   : > { %v739_v20 = vpop.f32.mrb[0].mxu0 }
  0xee   : > { %v755_v21 = vpop.f32.mrb[0].mxu1  ;;  %v365_v22 = vpop.f32.mrb[1].mxu0  ;;  %v494_v36 = vmax.f32 %v739_v20, 0.0 }
  0xef   : > { %v429_v23 = vpop.f32.mrb[1].mxu1  ;;  %v740_v24 = vpop.f32.mrb[2].mxu0  ;;  %v492_v27 = vmax.f32 %v365_v22, 0.0  ;;  %v510_v37 = vmax.f32 %v755_v21, 0.0 }
  0xf0   : > { %v756_v25 = vpop.f32.mrb[2].mxu1  ;;  %v508_v26 = vmax.f32 %v429_v23, 0.0  ;;  %v368_v28 = vpop.f32.mrb[3].mxu0  ;;  %v495_v42 = vmax.f32 %v740_v24, 0.0 }
  0xf1   : > { %v432_v29 = vpop.f32.mrb[3].mxu1  ;;  %524 = vxpose.xlu0.b32.start [1/16] (narrow) %v492_v27, 8  ;;  %v493_v30 = vmax.f32 %v368_v28, 0.0  ;;  %v511_v43 = vmax.f32 %v756_v25, 0.0 }
  0xf2   : > { %556 = vxpose.xlu1.b32.start [1/16] (narrow) %v508_v26, 8  ;;  %v509_v31 = vmax.f32 %v432_v29, 0.0 }
  0xf5   : > { %525 = vxpose.xlu0.b32.cont [2/16] (narrow) %v493_v30, 8  ;;  %v743_v32 = vpop.f32.mrb[4].mxu0 }
  0xf6   : > { %557 = vxpose.xlu1.b32.cont [2/16] (narrow) %v509_v31, 8  ;;  %v759_v33 = vpop.f32.mrb[4].mxu1  ;;  %v381_v34 = vpop.f32.mrb[5].mxu0  ;;  %v498_v60 = vmax.f32 %v743_v32, 0.0 }
  0xf7   : > { %v445_v35 = vpop.f32.mrb[5].mxu1  ;;  %v744_v38 = vpop.f32.mrb[6].mxu0  ;;  %v496_v44 = vmax.f32 %v381_v34, 0.0  ;;  %v514_v61 = vmax.f32 %v759_v33, 0.0 }
  0xf8   : > { %v760_v39 = vpop.f32.mrb[6].mxu1  ;;  %v384_v41 = vpop.f32.mrb[7].mxu0  ;;  %v512_v45 = vmax.f32 %v445_v35, 0.0  ;;  %v499_v2 = vmax.f32 %v744_v38, 0.0 }
  0xf9   : > { %v448_v40 = vpop.f32.mrb[7].mxu1  ;;  %526 = vxpose.xlu0.b32.cont [3/16] (narrow) %v494_v36, 8  ;;  %v497_v55 = vmax.f32 %v384_v41, 0.0  ;;  %v515_v3 = vmax.f32 %v760_v39, 0.0 }
  0xfa   : > { %558 = vxpose.xlu1.b32.cont [3/16] (narrow) %v510_v37, 8  ;;  %v513_v54 = vmax.f32 %v448_v40, 0.0 }
  0xfd   : > { %527 = vxpose.xlu0.b32.cont [4/16] (narrow) %v495_v42, 8  ;;  %v747_v46 = vpop.f32.mrb[8].mxu0 }
  0xfe   : > { %559 = vxpose.xlu1.b32.cont [4/16] (narrow) %v511_v43, 8  ;;  %v763_v47 = vpop.f32.mrb[8].mxu1  ;;  %v397_v48 = vpop.f32.mrb[9].mxu0  ;;  %v502_v8 = vmax.f32 %v747_v46, 0.0 }
  0xff   : > { %v461_v49 = vpop.f32.mrb[9].mxu1  ;;  %v748_v50 = vpop.f32.mrb[10].mxu0  ;;  %v500_v4 = vmax.f32 %v397_v48, 0.0  ;;  %v518_v9 = vmax.f32 %v763_v47, 0.0 }
 0x100   : > { %v764_v51 = vpop.f32.mrb[10].mxu1  ;;  %v400_v53 = vpop.f32.mrb[11].mxu0  ;;  %v516_v5 = vmax.f32 %v461_v49, 0.0  ;;  %v503_v10 = vmax.f32 %v748_v50, 0.0 }
 0x101   : > { %v464_v52 = vpop.f32.mrb[11].mxu1  ;;  %528 = vxpose.xlu0.b32.cont [5/16] (narrow) %v496_v44, 8  ;;  %v501_v7 = vmax.f32 %v400_v53, 0.0  ;;  %v519_v11 = vmax.f32 %v764_v51, 0.0 }
 0x102   : > { %560 = vxpose.xlu1.b32.cont [5/16] (narrow) %v512_v45, 8  ;;  %v517_v6 = vmax.f32 %v464_v52, 0.0 }
 0x105   : > { %529 = vxpose.xlu0.b32.cont [6/16] (narrow) %v497_v55, 8  ;;  %v751_v56 = vpop.f32.mrb[12].mxu0 }
 0x106   : > { %561 = vxpose.xlu1.b32.cont [6/16] (narrow) %v513_v54, 8  ;;  %v767_v57 = vpop.f32.mrb[12].mxu1  ;;  %v413_v58 = vpop.f32.mrb[13].mxu0  ;;  %v506_v16 = vmax.f32 %v751_v56, 0.0 }
 0x107   : > { %v477_v59 = vpop.f32.mrb[13].mxu1  ;;  %v752_v62 = vpop.f32.mrb[14].mxu0  ;;  %v504_v12 = vmax.f32 %v413_v58, 0.0  ;;  %v522_v17 = vmax.f32 %v767_v57, 0.0 }
 0x108   : > { %v768_v63 = vpop.f32.mrb[14].mxu1  ;;  %v416_v1 = vpop.f32.mrb[15].mxu0  ;;  %v520_v13 = vmax.f32 %v477_v59, 0.0  ;;  %v507_v18 = vmax.f32 %v752_v62, 0.0 }
 0x109   : > { %v480_v0 = vpop.f32.mrb[15].mxu1  ;;  %530 = vxpose.xlu0.b32.cont [7/16] (narrow) %v498_v60, 8  ;;  %v505_v15 = vmax.f32 %v416_v1, 0.0  ;;  %v523_v19 = vmax.f32 %v768_v63, 0.0 }
 0x10a   : > { %562 = vxpose.xlu1.b32.cont [7/16] (narrow) %v514_v61, 8  ;;  %v521_v14 = vmax.f32 %v480_v0, 0.0 }
 0x10d   : > { %531 = vxpose.xlu0.b32.cont [8/16] (narrow) %v499_v2, 8 }
 0x10e   : > { %563 = vxpose.xlu1.b32.cont [8/16] (narrow) %v515_v3, 8 }
 0x111   : > { %532 = vxpose.xlu0.b32.cont [9/16] (narrow) %v500_v4, 8 }
 0x112   : > { %564 = vxpose.xlu1.b32.cont [9/16] (narrow) %v516_v5, 8 }
 0x115   : > { %533 = vxpose.xlu0.b32.cont [10/16] (narrow) %v501_v7, 8 }
 0x116   : > { %565 = vxpose.xlu1.b32.cont [10/16] (narrow) %v517_v6, 8 }
 0x119   : > { %534 = vxpose.xlu0.b32.cont [11/16] (narrow) %v502_v8, 8 }
 0x11a   : > { %566 = vxpose.xlu1.b32.cont [11/16] (narrow) %v518_v9, 8 }
 0x11d   : > { %535 = vxpose.xlu0.b32.cont [12/16] (narrow) %v503_v10, 8 }
 0x11e   : > { %567 = vxpose.xlu1.b32.cont [12/16] (narrow) %v519_v11, 8 }
 0x121   : > { %536 = vxpose.xlu0.b32.cont [13/16] (narrow) %v504_v12, 8 }
 0x122   : > { %568 = vxpose.xlu1.b32.cont [13/16] (narrow) %v520_v13, 8 }
 0x125   : > { %537 = vxpose.xlu0.b32.cont [14/16] (narrow) %v505_v15, 8 }
 0x126   : > { %569 = vxpose.xlu1.b32.cont [14/16] (narrow) %v521_v14, 8 }
 0x129   : > { %538 = vxpose.xlu0.b32.cont [15/16] (narrow) %v506_v16, 8 }
 0x12a   : > { %570 = vxpose.xlu1.b32.cont [15/16] (narrow) %v522_v17, 8 }
 0x12d   : > { %539 = vxpose.xlu0.b32.end [16/16] (narrow) %v507_v18, 8 }
 0x12e   : > { %571 = vxpose.xlu1.b32.end [16/16] (narrow) %v523_v19, 8 }
 0x171   : > { %v540_v21 = vpop.trf.xlu0 }
 0x172   : > { %v572_v20 = vpop.trf.xlu1  ;;  %588 = vst [vmem:[%s137_s6] sm:$0xff] %v540_v21 }
 0x173   : > { %589 = vst [vmem:[%s137_s6 + $0x8] sm:$0xff] %v572_v20 }
 0x174   : > { %848 = shalt.err (!%p845_p3)
}
 0x175   : > { %s849_s25 = scalar_lea.hbm %s1017_s17, 256  ;;  %s853_s28 = scalar_lea.hbm %s1059_s2, 512 }
 0x176   : > { %p850_p4 = scmp.ne.s32.totalorder %s1017_s17, %s849_s25  ;;  %p854_p9 = scmp.lt.u32.totalorder %s1017_s17, %s1059_s2 }
 0x177   : > { %p855_p10 = scmp.lt.u32.totalorder %s853_s28, %s849_s25  ;;  %p857_p12 = scmp.lt.u32.totalorder %s849_s25, %s1017_s17 }
 0x178   : > { %p851_p7 = pnand %p850_p4, %p953_p5 }
 0x179   : > { %p856_p11 = por %p855_p10, %p854_p9 }
 0x17a   : > { %p852_p8 = pneg %p851_p7 }
 0x17b   : > { %p858_p13 = por %p857_p12, %p856_p11 }
 0x17d   : > { %p859_p0 = pnand %p858_p13, %p852_p8 }
 0x17f   : > { %862 = shalt.err (!%p859_p0)
}
 0x180   : > { %777 = dma.vmem_to_hbm [thread:$0]  (%p953_p5), %s1012_s7, 256, %s1017_s17, %s591_s21  }
 0x181 PF: > { %p783_p1 = scmp.ge.s32.totalorder %s897_s12, 2  ;;  %s617_s3 = sand.u32 1, %s885_s9  }
 0x182   : > { %s618_s4 = scalar_lea.sflag [#allocation3], %s617_s3 }
 0x183   : > { %p780_p2 = pnand %p783_p1, %p957_p6 }
 0x185   : > { %880 = dma.done.wait (!%p780_p2), %s618_s4, 256  }
 0x186   : > { %882 = vsyncadd (!%p780_p2), %s618_s4, 4294967040  ;;  %p12_p3 = scmp.ge.s32.totalorder %s940_s15, 4   ;;  %s1062_s9 = smov %s889_s10 }
 0x187   : > { %s1063_s10 = smov %s893_s11  ;;  %s1064_s11 = smov %s951_s18 }
 0x188   : > { %s1065_s12 = smov %s940_s15  ;;  %14 = sbr.rel (!%p12_p3) target bundleno = 3 (0x3), region = 63 }
 0x18f   :  { %623 = vsyncpa [#allocation3], 1 }
 0x190   :  { %625 = vsyncpa [#allocation3 + $0x1], 1 }

</bundles_post_ra>
